<compile_context>
chip_gen: v5e
topology: v5e:2x2
jax: 0.10.0
libtpu: 0.0.40
codegen_flags: <defaults>
</compile_context>

<pallas_src>
import jax
import jax.numpy as jnp
from jax.experimental import pallas as pl
from jax.experimental.pallas import tpu as pltpu

LEAKY_SLOPE = 0.01  # PyTorch nn.LeakyReLU default negative_slope


def _round_up(x, m):
    return ((x + m - 1) // m) * m


def _generator_mlp_kernel(z_ref, v_ref, w1z_ref, w1v_ref, b1_ref, w2_ref, b2_ref, o_ref):
    cdt = w1z_ref.dtype  # MXU compute dtype (param dtype); cast activations in-kernel
    h = jnp.dot(z_ref[...].astype(cdt), w1z_ref[...], preferred_element_type=jnp.float32)
    h = h + jnp.dot(v_ref[...].astype(cdt), w1v_ref[...], preferred_element_type=jnp.float32)
    h = h + b1_ref[...].astype(jnp.float32)
    h = jnp.where(h > 0, h, LEAKY_SLOPE * h)                       # LeakyReLU on f32 acc
    out = jnp.dot(h.astype(w2_ref.dtype), w2_ref[...],
                  preferred_element_type=jnp.float32)
    out = out + b2_ref[...].astype(jnp.float32)
    o_ref[...] = out.astype(o_ref.dtype)                           # narrow (imu_dim) store


def generator_forward(z, v, params, test=False):
    """Pallas implementation of Generator.forward.

    test=False: concat along features (dim=1)  -> fused into a split matmul.
    test=True : concat along batch (dim=0)     -> requires z/v features == z_dim + i3d_dim.
    Output dtype follows the parameter dtype (bf16 by default).
    """
    z_dim, i3d_dim, imu_dim = params["z_dim"], params["i3d_dim"], params["imu_dim"]
    d_in = z_dim + i3d_dim

    if test:
        if z.shape[1] != d_in or v.shape[1] != d_in:
            raise ValueError(
                f"test=True concatenates along dim 0 and requires z/v feature dims "
                f"== z_dim + i3d_dim ({d_in}); got {z.shape[1]} and {v.shape[1]}")
        # one concat per operand, no intermediate x + re-slice copies
        zz = jnp.concatenate([z[:, :z_dim], v[:, :z_dim]], axis=0)
        vv = jnp.concatenate([z[:, z_dim:], v[:, z_dim:]], axis=0)
    else:
        if z.shape[1] != z_dim or v.shape[1] != i3d_dim:
            raise ValueError(
                f"expected z features {z_dim} and v features {i3d_dim}; "
                f"got {z.shape[1]} and {v.shape[1]}")
        zz, vv = z, v

    w1z, w1v, b1, w2, b2 = (params["w1_z"], params["w1_v"], params["b1"],
                            params["w2"], params["b2"])
    p_dtype = w1z.dtype
    Zd, HP = w1z.shape          # HP: hidden padded to multiple of 128 (VMEM-internal)
    Vd = w1v.shape[0]
    OPd = w2.shape[1]           # == imu_dim (narrow output, no lane padding)
    B = zz.shape[0]

    a_item = jnp.dtype(zz.dtype).itemsize
    p_item = jnp.dtype(p_dtype).itemsize
    sub = 8 if min(a_item, p_item) >= 4 else 16   # sublane alignment (f32 vs packed dtypes)

    # Batch tile: big (amortize ~0.35us/step), but sized for >=2 grid steps when B
    # is large so the "parallel" axis shards across both v7x TensorCores.
    TB_CAP = 2048
    TB = min(TB_CAP, _round_up(pl.cdiv(B, 2), sub))
    grid_b = pl.cdiv(B, TB)

    # VMEM budget: inputs/outputs double-buffered + resident weights, generous margin.
    act_tile_bytes = TB * (Zd + Vd) * a_item + TB * OPd * p_item
    weight_bytes = ((Zd + Vd) * HP + HP + HP * OPd + OPd) * p_item
    needed = 2 * (act_tile_bytes + weight_bytes)
    vmem_limit = int(min(max(3 * needed + (4 << 20), 8 << 20), 60 << 20))

    cost = pl.CostEstimate(
        flops=2 * B * ((Zd + Vd) * HP + HP * OPd),
        transcendentals=0,
        bytes_accessed=((zz.size + vv.size) * a_item
                        + ((Zd + Vd) * HP + HP + HP * OPd + OPd) * p_item
                        + B * OPd * p_item),
    )

    out = pl.pallas_call(
        _generator_mlp_kernel,
        out_shape=jax.ShapeDtypeStruct((B, OPd), p_dtype),
        grid_spec=pltpu.PrefetchScalarGridSpec(
            num_scalar_prefetch=0,
            grid=(grid_b,),
            in_specs=[
                pl.BlockSpec((TB, Zd), lambda i: (i, 0)),     # activations tiled over batch
                pl.BlockSpec((TB, Vd), lambda i: (i, 0)),
                pl.BlockSpec((Zd, HP), lambda i: (0, 0)),     # weights/biases VMEM-resident
                pl.BlockSpec((Vd, HP), lambda i: (0, 0)),
                pl.BlockSpec((1, HP), lambda i: (0, 0)),
                pl.BlockSpec((HP, OPd), lambda i: (0, 0)),
                pl.BlockSpec((1, OPd), lambda i: (0, 0)),
            ],
            out_specs=pl.BlockSpec((TB, OPd), lambda i: (i, 0)),
        ),
        compiler_params=pltpu.CompilerParams(
            dimension_semantics=("parallel",),                # megacore sharding on v7x
            vmem_limit_bytes=vmem_limit),
        cost_estimate=cost,
    )(zz, vv, w1z, w1v, b1, w2, b2)

    return out


def init_generator_params(key, i3d_dim, z_dim, hidden_dim, imu_dim, dtype=jnp.bfloat16):
    """Deterministic synthetic init matching nn.Linear default bounds.

    Weights stored pre-transposed ([in, out], x @ W + b) and split (w1_z / w1_v)
    for the fused concat. Hidden dim is zero-padded to a multiple of 128
    (exact: padded b1 cols are zero -> h==0 there; padded w2 rows are zero).
    Output dim is kept NARROW (imu_dim) to minimize HBM writeback. bf16 default.
    """
    k1, k2, k3, k4 = jax.random.split(key, 4)
    d_in = z_dim + i3d_dim
    lim1 = 1.0 / (d_in ** 0.5)
    lim2 = 1.0 / (hidden_dim ** 0.5)

    w1 = jax.random.uniform(k1, (d_in, hidden_dim), jnp.float32, -lim1, lim1)
    b1 = jax.random.uniform(k2, (hidden_dim,), jnp.float32, -lim1, lim1)
    w2 = jax.random.uniform(k3, (hidden_dim, imu_dim), jnp.float32, -lim2, lim2)
    b2 = jax.random.uniform(k4, (imu_dim,), jnp.float32, -lim2, lim2)

    HP = _round_up(hidden_dim, 128)
    w1p = jnp.zeros((d_in, HP), jnp.float32).at[:, :hidden_dim].set(w1)
    b1p = jnp.zeros((1, HP), jnp.float32).at[0, :hidden_dim].set(b1)
    w2p = jnp.zeros((HP, imu_dim), jnp.float32).at[:hidden_dim, :].set(w2)
    b2p = b2.reshape(1, imu_dim)

    return {
        "w1_z": w1p[:z_dim].astype(dtype),
        "w1_v": w1p[z_dim:].astype(dtype),
        "b1": b1p.astype(dtype),
        "w2": w2p.astype(dtype),
        "b2": b2p.astype(dtype),
        "z_dim": z_dim, "i3d_dim": i3d_dim,
        "hidden_dim": hidden_dim, "imu_dim": imu_dim,
        # unpadded copies, only used by the pure-JAX reference
        "_w1": w1.astype(dtype), "_b1": b1.astype(dtype),
        "_w2": w2.astype(dtype), "_b2": b2.astype(dtype),
    }


def _reference_forward(z, v, params, test=False):
    x = jnp.concatenate([z, v], axis=0 if test else 1).astype(jnp.float32)
    h = x @ params["_w1"].astype(jnp.float32) + params["_b1"].astype(jnp.float32)
    h = jnp.where(h > 0, h, LEAKY_SLOPE * h)
    return h @ params["_w2"].astype(jnp.float32) + params["_b2"].astype(jnp.float32)


if __name__ == "__main__":
    # Small shapes consistent with the module's forward.
    B, z_dim, i3d_dim, hidden_dim, imu_dim = 4, 8, 32, 64, 12

    key = jax.random.PRNGKey(0)
    kz, kv, kp, kt = jax.random.split(key, 4)
    z = jax.random.normal(kz, (B, z_dim), jnp.float32)
    v = jax.random.normal(kv, (B, i3d_dim), jnp.float32)

    # --- f32 path (strict check, partial block: B=4 < TB) ---
    params = init_generator_params(kp, i3d_dim, z_dim, hidden_dim, imu_dim, jnp.float32)
    out = jax.block_until_ready(generator_forward(z, v, params, test=False))
    ref = _reference_forward(z, v, params, test=False)
    assert out.shape == (B, imu_dim), out.shape
    assert jnp.allclose(out, ref, atol=1e-5, rtol=1e-5), "f32 mismatch vs reference"

    # --- non-divisible batch (multi-step grid + masked trailing block) ---
    B2 = 20
    z2 = jax.random.normal(kz, (B2, z_dim), jnp.float32)
    v2 = jax.random.normal(kv, (B2, i3d_dim), jnp.float32)
    out2 = jax.block_until_ready(generator_forward(z2, v2, params, test=False))
    ref2 = _reference_forward(z2, v2, params, test=False)
    assert out2.shape == (B2, imu_dim), out2.shape
    assert jnp.allclose(out2, ref2, atol=1e-5, rtol=1e-5), "partial-block mismatch vs reference"

    # --- test=True path (concat along batch; requires matching feature dims) ---
    d_in = z_dim + i3d_dim
    zt = jax.random.normal(kt, (2, d_in), jnp.float32)
    vt = jax.random.normal(kv, (2, d_in), jnp.float32)
    out_t = jax.block_until_ready(generator_forward(zt, vt, params, test=True))
    ref_t = _reference_forward(zt, vt, params, test=True)
    assert out_t.shape == (4, imu_dim), out_t.shape
    assert jnp.allclose(out_t, ref_t, atol=1e-5, rtol=1e-5), "test=True mismatch vs reference"

    # --- bf16 default params, f32 activations cast inside the kernel (loose tol) ---
    params_bf16 = init_generator_params(kp, i3d_dim, z_dim, hidden_dim, imu_dim)  # bf16 default
    out_bf16 = jax.block_until_ready(generator_forward(z, v, params_bf16, test=False))
    ref_bf16 = _reference_forward(z, v, params_bf16, test=False)
    assert out_bf16.shape == (B, imu_dim), out_bf16.shape
    assert jnp.allclose(out_bf16.astype(jnp.float32), ref_bf16, atol=1e-1, rtol=1e-1), \
        "bf16 mismatch vs reference"

    print("KERNEL_OK")
</pallas_src>

<mosaic_0001>
module attributes {stable_mosaic.version = 11 : i64} {
  func.func @_generator_mlp_kernel(%arg0: i32, %arg1: memref<8x8xf32, #tpu.memory_space<vmem>>, %arg2: memref<8x32xf32, #tpu.memory_space<vmem>>, %arg3: memref<8x128xf32, #tpu.memory_space<vmem>>, %arg4: memref<32x128xf32, #tpu.memory_space<vmem>>, %arg5: memref<1x128xf32, #tpu.memory_space<vmem>>, %arg6: memref<128x12xf32, #tpu.memory_space<vmem>>, %arg7: memref<1x12xf32, #tpu.memory_space<vmem>>, %arg8: memref<8x12xf32, #tpu.memory_space<vmem>>) attributes {dimension_semantics = [#tpu.dimension_semantics<parallel>], iteration_bounds = array<i64: 1>, scalar_prefetch = 0 : i64, scratch_operands = 0 : i64, tpu.core_type = #tpu.core_type<tc>, window_params = [{transform_indices = @transform_0, window_bounds = array<i64: 8, 8>}, {transform_indices = @transform_1, window_bounds = array<i64: 8, 32>}, {pipeline_mode = #tpu.pipeline_mode<synchronous>, transform_indices = @transform_2, window_bounds = array<i64: 8, 128>}, {pipeline_mode = #tpu.pipeline_mode<synchronous>, transform_indices = @transform_3, window_bounds = array<i64: 32, 128>}, {pipeline_mode = #tpu.pipeline_mode<synchronous>, transform_indices = @transform_4, window_bounds = array<i64: 1, 128>}, {pipeline_mode = #tpu.pipeline_mode<synchronous>, transform_indices = @transform_5, window_bounds = array<i64: 128, 12>}, {pipeline_mode = #tpu.pipeline_mode<synchronous>, transform_indices = @transform_6, window_bounds = array<i64: 1, 12>}, {transform_indices = @transform_7, window_bounds = array<i64: 8, 12>}]} {
    %c0 = arith.constant 0 : index
    %c0_0 = arith.constant 0 : index
    %0 = vector.load %arg1[%c0, %c0_0] : memref<8x8xf32, #tpu.memory_space<vmem>>, vector<8x8xf32>
    %c0_1 = arith.constant 0 : index
    %c0_2 = arith.constant 0 : index
    %1 = vector.load %arg3[%c0_1, %c0_2] : memref<8x128xf32, #tpu.memory_space<vmem>>, vector<8x128xf32>
    %cst = arith.constant dense<0.000000e+00> : vector<8x128xf32>
    %2 = tpu.matmul %0, %1, %cst {dimension_numbers = #tpu.dot_dimension_numbers<[1], [0], [0], [1], [0, 0, 1, 1], [], []>} : vector<8x8xf32>, vector<8x128xf32>, vector<8x128xf32> -> vector<8x128xf32>
    %c0_3 = arith.constant 0 : index
    %c0_4 = arith.constant 0 : index
    %3 = vector.load %arg2[%c0_3, %c0_4] : memref<8x32xf32, #tpu.memory_space<vmem>>, vector<8x32xf32>
    %c0_5 = arith.constant 0 : index
    %c0_6 = arith.constant 0 : index
    %4 = vector.load %arg4[%c0_5, %c0_6] : memref<32x128xf32, #tpu.memory_space<vmem>>, vector<32x128xf32>
    %cst_7 = arith.constant dense<0.000000e+00> : vector<8x128xf32>
    %5 = tpu.matmul %3, %4, %cst_7 {dimension_numbers = #tpu.dot_dimension_numbers<[1], [0], [0], [1], [0, 0, 1, 1], [], []>} : vector<8x32xf32>, vector<32x128xf32>, vector<8x128xf32> -> vector<8x128xf32>
    %6 = arith.addf %2, %5 : vector<8x128xf32>
    %c0_8 = arith.constant 0 : index
    %c0_9 = arith.constant 0 : index
    %7 = vector.load %arg5[%c0_8, %c0_9] : memref<1x128xf32, #tpu.memory_space<vmem>>, vector<1x128xf32>
    %8 = vector.broadcast %7 : vector<1x128xf32> to vector<8x128xf32>
    %9 = arith.addf %6, %8 : vector<8x128xf32>
    %cst_10 = arith.constant 0.000000e+00 : f32
    %10 = vector.broadcast %cst_10 : f32 to vector<8x128xf32>
    %11 = arith.cmpf ogt, %9, %10 : vector<8x128xf32>
    %cst_11 = arith.constant 0.00999999977 : f32
    %12 = vector.broadcast %cst_11 : f32 to vector<8x128xf32>
    %13 = arith.mulf %12, %9 : vector<8x128xf32>
    %14 = arith.select %11, %9, %13 : vector<8x128xi1>, vector<8x128xf32>
    %c0_12 = arith.constant 0 : index
    %c0_13 = arith.constant 0 : index
    %15 = vector.load %arg6[%c0_12, %c0_13] : memref<128x12xf32, #tpu.memory_space<vmem>>, vector<128x12xf32>
    %cst_14 = arith.constant dense<0.000000e+00> : vector<8x12xf32>
    %16 = tpu.matmul %14, %15, %cst_14 {dimension_numbers = #tpu.dot_dimension_numbers<[1], [0], [0], [1], [0, 0, 1, 1], [], []>} : vector<8x128xf32>, vector<128x12xf32>, vector<8x12xf32> -> vector<8x12xf32>
    %c0_15 = arith.constant 0 : index
    %c0_16 = arith.constant 0 : index
    %17 = vector.load %arg7[%c0_15, %c0_16] : memref<1x12xf32, #tpu.memory_space<vmem>>, vector<1x12xf32>
    %18 = vector.broadcast %17 : vector<1x12xf32> to vector<8x12xf32>
    %19 = arith.addf %16, %18 : vector<8x12xf32>
    %c0_17 = arith.constant 0 : index
    %c0_18 = arith.constant 0 : index
    %20 = vector.load %arg8[%c0_17, %c0_18] : memref<8x12xf32, #tpu.memory_space<vmem>>, vector<8x12xf32>
    tpu.vector_store %arg8[%c0_17, %c0_18], %19 {strides = array<i32>} : memref<8x12xf32, #tpu.memory_space<vmem>>, vector<8x12xf32>,
    return
  }
  func.func @transform_0(%arg0: i32) -> (i32, i32) {
    %c0_i32 = arith.constant 0 : i32
    %c0_i32_0 = arith.constant 0 : i32
    return %arg0, %c0_i32 : i32, i32
  }
  func.func @transform_1(%arg0: i32) -> (i32, i32) {
    %c0_i32 = arith.constant 0 : i32
    %c0_i32_0 = arith.constant 0 : i32
    return %arg0, %c0_i32 : i32, i32
  }
  func.func @transform_2(%arg0: i32) -> (i32, i32) {
    %c0_i32 = arith.constant 0 : i32
    %c0_i32_0 = arith.constant 0 : i32
    %c0_i32_1 = arith.constant 0 : i32
    return %c0_i32, %c0_i32_0 : i32, i32
  }
  func.func @transform_3(%arg0: i32) -> (i32, i32) {
    %c0_i32 = arith.constant 0 : i32
    %c0_i32_0 = arith.constant 0 : i32
    %c0_i32_1 = arith.constant 0 : i32
    return %c0_i32, %c0_i32_0 : i32, i32
  }
  func.func @transform_4(%arg0: i32) -> (i32, i32) {
    %c0_i32 = arith.constant 0 : i32
    %c0_i32_0 = arith.constant 0 : i32
    %c0_i32_1 = arith.constant 0 : i32
    return %c0_i32, %c0_i32_0 : i32, i32
  }
  func.func @transform_5(%arg0: i32) -> (i32, i32) {
    %c0_i32 = arith.constant 0 : i32
    %c0_i32_0 = arith.constant 0 : i32
    %c0_i32_1 = arith.constant 0 : i32
    return %c0_i32, %c0_i32_0 : i32, i32
  }
  func.func @transform_6(%arg0: i32) -> (i32, i32) {
    %c0_i32 = arith.constant 0 : i32
    %c0_i32_0 = arith.constant 0 : i32
    %c0_i32_1 = arith.constant 0 : i32
    return %c0_i32, %c0_i32_0 : i32, i32
  }
  func.func @transform_7(%arg0: i32) -> (i32, i32) {
    %c0_i32 = arith.constant 0 : i32
    %c0_i32_0 = arith.constant 0 : i32
    return %arg0, %c0_i32 : i32, i32
  }
}

</mosaic_0001>

<bundles_post_ra>
// kernel: tpu_custom_call.1
= control target key start
LH: loop header
LB: loop body
LE: loop exit
PB: predicated region body
PF: predicated region fallthrough
CT: control target
= control target key end

     0   :  { %12 = vsyncpa [#allocation3], 0  ;;  %vm58_vm0 = vcmask 64512   ;;  %vm34_vm1 = vcmask 261120   ;;  %vm130_vm3 = vcmask 97280   ;;  %s304_s0 = inlined_call_operand.vmem [shape: f32[4,8], index: 0, kind: input, shape index: {}]   ;;  %s305_s1 = inlined_call_operand.vmem [shape: f32[4,32], index: 1, kind: input, shape index: {}]   ;;  %s306_s2 = inlined_call_operand.vmem [shape: f32[8,128], index: 2, kind: input, shape index: {}]   ;;  %s307_s3 = inlined_call_operand.vmem [shape: f32[32,128], index: 3, kind: input, shape index: {}]   ;;  %s308_s4 = inlined_call_operand.vmem [shape: f32[1,128], index: 4, kind: input, shape index: {}]   ;;  %s309_s5 = inlined_call_operand.vmem [shape: f32[128,12], index: 5, kind: input, shape index: {}]   ;;  %s310_s6 = inlined_call_operand.vmem [shape: f32[1,12], index: 6, kind: input, shape index: {}]   ;;  %s311_s7 = inlined_call_operand.hbm [shape: f32[4,12], index: 7, kind: output, shape index: {}]  }
   0x1   :  { %v33_v0 = vld [vmem:[%s307_s3 + $0x18] sm:$0xff]  ;;  %v32_v1 = vld [vmem:[%s307_s3 + $0x10] sm:$0xff]  ;;  %v28_v2 = vld [vmem:[%s306_s2] sm:$0xff] }
   0x2   :  { %50 = vmatpush.msra.mxu0 %v33_v0  ;;  %v31_v3 = vld [vmem:[%s307_s3 + $0x8] sm:$0xff]  ;;  %77 = vmatpush.msra.mxu1 %v28_v2  ;;  %v27_v4 = vld [vmem:[%s304_s0] sm:$0xff]  ;;  %v105_v5 = vld [vmem:[%s309_s5 + $0x78] sm:$0xff] }
   0x3   :  { %151 = vmatmul.msk.f32.vlgmr.msra.gmra.mxu1 %vm58_vm0, %v27_v4  ;;  %v104_v6 = vld [vmem:[%s309_s5 + $0x70] sm:$0xff]  ;;  %v30_v7 = vld [vmem:[%s307_s3] sm:$0xff]  ;;  %110 = vmatpush.msra.mxu2 %v105_v5  ;;  %v103_v9 = vld [vmem:[%s309_s5 + $0x68] sm:$0xff] }
   0x4   :  { %51 = vmatpush.msra.mxu0 %v32_v1  ;;  %v29_v8 = vld [vmem:[%s305_s1] sm:$0xff]  ;;  %v101_v11 = vld [vmem:[%s309_s5 + $0x58] sm:$0xff]  ;;  %v100_v12 = vld [vmem:[%s309_s5 + $0x50] sm:$0xff] }
   0x5   :  { %111 = vmatpush.msra.mxu2 %v104_v6  ;;  %v102_v10 = vld [vmem:[%s309_s5 + $0x60] sm:$0xff]  ;;  %v99_v13 = vld [vmem:[%s309_s5 + $0x48] sm:$0xff]  ;;  %v97_v15 = vld [vmem:[%s309_s5 + $0x38] sm:$0xff] }
   0x6   :  { %52 = vmatpush.msra.mxu0 %v31_v3  ;;  %v98_v14 = vld [vmem:[%s309_s5 + $0x40] sm:$0xff]  ;;  %v96_v16 = vld [vmem:[%s309_s5 + $0x30] sm:$0xff]  ;;  %v95_v17 = vld [vmem:[%s309_s5 + $0x28] sm:$0xff] }
   0x7   :  { %112 = vmatpush.msra.mxu2 %v103_v9  ;;  %v94_v18 = vld [vmem:[%s309_s5 + $0x20] sm:$0xff]  ;;  %v93_v19 = vld [vmem:[%s309_s5 + $0x18] sm:$0xff]  ;;  %v92_v20 = vld [vmem:[%s309_s5 + $0x10] sm:$0xff] }
   0x8   :  { %53 = vmatpush.msra.mxu0 %v30_v7  ;;  %v91_v21 = vld [vmem:[%s309_s5 + $0x8] sm:$0xff]  ;;  %v90_v22 = vld [vmem:[%s309_s5] sm:$0xff] }
   0x9   :  { %150 = vmatmul.msk.f32.vlgmr.msra.gmra.mxu0 %vm34_vm1, %v29_v8  ;;  %113 = vmatpush.msra.mxu2 %v102_v10  ;;  %v155_v24 = vld [vmem:[%s308_s4] ss:$0 sm:$0xff] }
   0xa   :  { %v156_v30 = vld [vmem:[%s310_s6] ss:$0 sm:$0xff] }
   0xb   :  { %114 = vmatpush.msra.mxu2 %v101_v11 }
   0xd   :  { %115 = vmatpush.msra.mxu2 %v100_v12 }
   0xf   :  { %116 = vmatpush.msra.mxu2 %v99_v13 }
  0x11   :  { %117 = vmatpush.msra.mxu2 %v98_v14 }
  0x13   :  { %118 = vmatpush.msra.mxu2 %v97_v15 }
  0x15   :  { %119 = vmatpush.msra.mxu2 %v96_v16 }
  0x17   :  { %120 = vmatpush.msra.mxu2 %v95_v17 }
  0x19   :  { %121 = vmatpush.msra.mxu2 %v94_v18 }
  0x1b   :  { %122 = vmatpush.msra.mxu2 %v93_v19 }
  0x1d   :  { %123 = vmatpush.msra.mxu2 %v92_v20 }
  0x1f   :  { %124 = vmatpush.msra.mxu2 %v91_v21 }
  0x21   :  { %125 = vmatpush.msra.mxu2 %v90_v22 }
  0x80   :  { %v79_v23 = vpop.f32.mrf.mxu1 }
  0x86   :  { %v55_v25 = vpop.f32.mrf.mxu0 }
  0x87   :  { %v80_v26 = vadd.f32 %v79_v23, %v55_v25 }
  0x89   :  { %v86_v27 = vadd.f32 %v155_v24, %v80_v26 }
  0x8b   :  { %vm87_vm2 = vcmp.gt.f32.partialorder %v86_v27, 0.0  ;;  %v88_v28 = vmul.f32 0.01, %v86_v27 }
  0x8d   :  { %v89_v29 = vsel %vm87_vm2, %v86_v27, %v88_v28 }
  0x8e   :  { %126 = vmatmul.f32.vlgmr.msra.gmra.mxu2 %v89_v29 }
 0x111   :  { %v127_v31 = vpop.f32.mrf.mxu2 }
 0x112   :  { %v128_v32 = vadd.f32 %v156_v30, %v127_v31 }
 0x114   :  { %131 = vst.msk [vmem:[#allocation2] sm:$0xff] %vm130_vm3, %v128_v32 }
 0x115   :  { %135 = vsyncadd [#allocation3], 64  ;;  %s138_s4 = sshll.u32 %s311_s7, 4  ;;  %s183_s22 = smov [#allocation2]   ;;  %s139_s4 = int_to_ptr.hbm [resolvable:$true] %s138_s4 }
 0x116   :  { %s136_s1 = sshll.u32 %s183_s22, 4  ;;  %s184_s23 = smov 64   ;;  %s137_s1 = int_to_ptr.vmem [resolvable:$true] %s136_s1 }
 0x117   :  { %s185_s24 = smov 4  }
 0x118   :  { %144 = dma.vmem_to_hbm [thread:$0]  %s137_s1, 64, %s139_s4, [#allocation3], %s184_s23, %s184_s23, %s185_s24  }
 0x119   :  { %181 = dma.done.wait [#allocation3], 128  }
 0x11a   :  { %182 = vsyncadd [#allocation3], 4294967168 }
 0x11b   :  { %149 = vsyncpa [#allocation3], 1 }

</bundles_post_ra>
